<compile_context>
chip_gen: v6e
topology: v6e:2x2x1
jax: 0.10.0
libtpu: 0.0.40
codegen_flags: <defaults>
</compile_context>

<pallas_src>
import functools

import jax
import jax.numpy as jnp
from jax.experimental import pallas as pl
from jax.experimental.pallas import tpu as pltpu


# ------------------------------ Pallas kernels ------------------------------

def _conv_bn_relu(x1_ref, x2_ref, wa_ref, wb_ref, shift_ref):
    """1x1 conv over the (virtually) concatenated channels + folded BN + ReLU.

    The concat is never materialized: W = [Wa | Wb] and y = Wa@x1 + Wb@x2.
    BN scale is pre-folded into Wa/Wb on the host, only the shift remains.
    """
    y = jnp.dot(wa_ref[...], x1_ref[0], preferred_element_type=jnp.float32)
    y = y + jnp.dot(wb_ref[...], x2_ref[0], preferred_element_type=jnp.float32)
    return jnp.maximum(y + shift_ref[...], 0.0)               # (Cout, T)


def _pool_kernel(x1_ref, x2_ref, wa_ref, wb_ref, shift_ref, psum_ref, *,
                 hw, tile_hw, tiles_per_group, n_hw):
    # x1: (1,C1,T)  x2: (1,C2,T)  wa: (Cout,C1)  wb: (Cout,C2)  shift: (Cout,1)
    # psum: (1,1,Cout,1)  -- revisited accumulator across the (arbitrary) j axis.
    p = pl.program_id(1)
    j = pl.program_id(2)
    t = p * tiles_per_group + j          # global HW-tile index (may overrun n_hw)

    fm = _conv_bn_relu(x1_ref, x2_ref, wa_ref, wb_ref, shift_ref)

    @pl.when(j == 0)
    def _():
        psum_ref[...] = jnp.zeros_like(psum_ref)

    @pl.when(t < n_hw - 1)
    def _():
        # Interior tiles: every column is valid -> unmasked lane reduction.
        psum_ref[0, 0] += jnp.sum(fm, axis=1, keepdims=True)

    @pl.when(t >= n_hw - 1)
    def _():
        # Boundary tile (ragged columns read OOB garbage) and clamped duplicate
        # tiles from the parallel group split: mask by the global column index.
        col = t * tile_hw + jax.lax.broadcasted_iota(jnp.int32, fm.shape, 1)
        psum_ref[0, 0] += jnp.sum(jnp.where(col < hw, fm, 0.0),
                                  axis=1, keepdims=True)


def _apply_kernel(x1_ref, x2_ref, wa_ref, wb_ref, shift_ref, psum_ref,
                  w1t_ref, w2_ref, out_ref, *, inv_hw):
    # psum: (1,P,Cout,1)  w1t: (Cout,Cmid)  w2: (Cout,Cmid)  out: (1,Cout,T)
    # Recompute fm from the resident weights instead of re-reading a stored f32
    # fm from HBM (removes a full Cout*HW write + read pass).
    fm = _conv_bn_relu(x1_ref, x2_ref, wa_ref, wb_ref, shift_ref)   # (Cout, T)

    # Tiny SE head (AdaptiveAvgPool -> 1x1+ReLU -> 1x1 -> sigmoid), recomputed
    # per grid step via VPU broadcast+reduce (no transposes / narrow matmuls),
    # which keeps both grid axes fully parallel for megacore sharding.
    pooled = jnp.sum(psum_ref[0], axis=0) * inv_hw                  # (Cout, 1)
    h = jnp.maximum(
        jnp.sum(w1t_ref[...] * pooled, axis=0, keepdims=True), 0.0)  # (1, Cmid)
    s = jnp.sum(w2_ref[...] * h, axis=1, keepdims=True)             # (Cout, 1)
    se = 1.0 + jax.nn.sigmoid(s)                                    # fm + fm*se

    out_ref[0] = (fm * se).astype(out_ref.dtype)


# ------------------------------ host-side glue ------------------------------

def feature_fusion(x1, x2, params, *, tile_hw=None):
    """FeatureFusion forward: cat -> 1x1 ConvBnRelu -> channel attention ->
    fm + fm*fm_se.  x1/x2 are NCHW (float32)."""
    N, C1, H, W = x1.shape
    C2 = x2.shape[1]
    HW = H * W

    w_fuse = params["w_fuse"]                          # (Cout, C1+C2), bias=False
    Cout = w_fuse.shape[0]
    Cmid = params["w_ca1"].shape[0]

    # Fold eval-mode BatchNorm: scale into the conv weights, keep only the shift.
    scale = params["bn_gamma"] / jnp.sqrt(params["bn_var"] + 1e-5)
    shift = (params["bn_beta"] - params["bn_mean"] * scale).reshape(Cout, 1)
    shift = shift.astype(jnp.float32)
    wa = (w_fuse[:, :C1] * scale[:, None]).astype(jnp.float32)      # (Cout, C1)
    wb = (w_fuse[:, C1:] * scale[:, None]).astype(jnp.float32)      # (Cout, C2)
    w1t = params["w_ca1"].T.astype(jnp.float32)                     # (Cout, Cmid)
    w2 = params["w_ca2"].astype(jnp.float32)                        # (Cout, Cmid)

    # NCHW kept end-to-end; these reshapes are metadata-only views (no pad pass).
    x1r = x1.reshape(N, C1, HW)
    x2r = x2.reshape(N, C2, HW)

    # HW tile: as large as a ~8 MiB double-buffered streaming budget allows
    # (per-grid-step overhead ~0.35 us; 1-2K lanes ~ HBM roofline).  When HW fits
    # in one tile the accumulator path degenerates to a single step.
    if tile_hw is None:
        bytes_per_col = 4 * (C1 + C2 + Cout)           # f32 streamed per column
        cap = (8 * 1024 * 1024) // (2 * bytes_per_col)
        cap = max(128, min(2048, (cap // 128) * 128))
        tile_hw = HW if HW <= cap else cap             # full tile, or 128-multiple
    n_hw = pl.cdiv(HW, tile_hw)

    # Megacore-friendly parallel split of the pooling tiles (helps v7x, small N).
    P = 2 if n_hw >= 2 else 1
    tpg = pl.cdiv(n_hw, P)                             # tiles per parallel group

    # Explicit VMEM limit: above v5e's 16 MiB scoped default, within v7x's 64 MiB.
    weight_bytes = 4 * (Cout * (C1 + C2 + 1) + 2 * Cout * Cmid)
    stream_bytes = 2 * 2 * 4 * tile_hw * (C1 + C2 + Cout)
    vmem_limit = int(min(max(4 * weight_bytes + 2 * stream_bytes, 32 << 20),
                         48 << 20))
    # NOTE: weights/shift use constant index maps so they are fetched once; at
    # very large Cout, pipeline_mode=pl.Buffered(1) on them would also avoid the
    # (harmless) double-buffer allocation.

    # ---- Kernel 1: fused concat + 1x1 conv + BN + ReLU + global-pool partials --
    k1 = functools.partial(_pool_kernel, hw=HW, tile_hw=tile_hw,
                           tiles_per_group=tpg, n_hw=n_hw)
    x_map = lambda n, p, j: (n, 0, jnp.minimum(p * tpg + j, n_hw - 1))
    psum = pl.pallas_call(
        k1,
        grid=(N, P, tpg),
        in_specs=[
            pl.BlockSpec((1, C1, tile_hw), x_map),
            pl.BlockSpec((1, C2, tile_hw), x_map),
            pl.BlockSpec((Cout, C1), lambda n, p, j: (0, 0)),   # weights resident
            pl.BlockSpec((Cout, C2), lambda n, p, j: (0, 0)),
            pl.BlockSpec((Cout, 1), lambda n, p, j: (0, 0)),    # BN shift
        ],
        out_specs=pl.BlockSpec((1, 1, Cout, 1), lambda n, p, j: (n, p, 0, 0)),
        out_shape=jax.ShapeDtypeStruct((N, P, Cout, 1), jnp.float32),
        compiler_params=pltpu.CompilerParams(
            dimension_semantics=("parallel", "parallel", "arbitrary"),
            vmem_limit_bytes=vmem_limit),
        cost_estimate=pl.CostEstimate(
            flops=2 * N * HW * (C1 + C2) * Cout,
            transcendentals=0,
            bytes_accessed=4 * N * HW * (C1 + C2)),
    )(x1r, x2r, wa, wb, shift)

    # ---- Kernel 2: recompute fm, fused SE head, out = fm * (1 + se) ----
    k2 = functools.partial(_apply_kernel, inv_hw=1.0 / HW)
    out = pl.pallas_call(
        k2,
        grid=(N, n_hw),
        in_specs=[
            pl.BlockSpec((1, C1, tile_hw), lambda n, j: (n, 0, j)),
            pl.BlockSpec((1, C2, tile_hw), lambda n, j: (n, 0, j)),
            pl.BlockSpec((Cout, C1), lambda n, j: (0, 0)),
            pl.BlockSpec((Cout, C2), lambda n, j: (0, 0)),
            pl.BlockSpec((Cout, 1), lambda n, j: (0, 0)),
            pl.BlockSpec((1, P, Cout, 1), lambda n, j: (n, 0, 0, 0)),
            pl.BlockSpec((Cout, Cmid), lambda n, j: (0, 0)),
            pl.BlockSpec((Cout, Cmid), lambda n, j: (0, 0)),
        ],
        out_specs=pl.BlockSpec((1, Cout, tile_hw), lambda n, j: (n, 0, j)),
        out_shape=jax.ShapeDtypeStruct((N, Cout, HW), jnp.float32),
        compiler_params=pltpu.CompilerParams(
            dimension_semantics=("parallel", "parallel"),
            vmem_limit_bytes=vmem_limit),
        cost_estimate=pl.CostEstimate(
            flops=2 * N * HW * (C1 + C2) * Cout + 4 * N * n_hw * Cout * Cmid,
            transcendentals=N * n_hw * Cout,
            bytes_accessed=4 * N * HW * (C1 + C2 + Cout)),
    )(x1r, x2r, wa, wb, shift, psum, w1t, w2)

    return out.reshape(N, Cout, H, W)


# ------------------------------ validation ------------------------------

def _reference(x1, x2, params):
    """Pure-JAX reference with identical semantics (for validation)."""
    x = jnp.concatenate([x1, x2], axis=1)
    y = jnp.einsum("oc,nchw->nohw", params["w_fuse"], x)
    scale = params["bn_gamma"] / jnp.sqrt(params["bn_var"] + 1e-5)
    shift = params["bn_beta"] - params["bn_mean"] * scale
    fm = jnp.maximum(y * scale[None, :, None, None]
                     + shift[None, :, None, None], 0.0)
    pooled = fm.mean(axis=(2, 3))
    h = jnp.maximum(pooled @ params["w_ca1"].T, 0.0)
    se = jax.nn.sigmoid(h @ params["w_ca2"].T)
    return fm + fm * se[:, :, None, None]


def _make_params(key, C1, C2, Cout, Cmid):
    ks = jax.random.split(key, 7)
    return dict(
        w_fuse=0.1 * jax.random.normal(ks[0], (Cout, C1 + C2), jnp.float32),
        bn_gamma=1.0 + 0.1 * jax.random.normal(ks[1], (Cout,), jnp.float32),
        bn_beta=0.1 * jax.random.normal(ks[2], (Cout,), jnp.float32),
        bn_mean=0.05 * jax.random.normal(ks[3], (Cout,), jnp.float32),
        bn_var=1.0 + jnp.abs(0.1 * jax.random.normal(ks[4], (Cout,), jnp.float32)),
        w_ca1=0.1 * jax.random.normal(ks[5], (Cmid, Cout), jnp.float32),
        w_ca2=0.1 * jax.random.normal(ks[6], (Cout, Cmid), jnp.float32),
    )


if __name__ == "__main__":
    key = jax.random.PRNGKey(0)
    key_a, key_b = jax.random.split(key)

    # Config A: nominal small shapes (single full-extent HW tile per image).
    kp, kx1, kx2 = jax.random.split(key_a, 3)
    params = _make_params(kp, 4, 4, 8, 8)
    x1 = jax.random.normal(kx1, (2, 4, 16, 16), jnp.float32)
    x2 = jax.random.normal(kx2, (2, 4, 16, 16), jnp.float32)
    out = jax.block_until_ready(feature_fusion(x1, x2, params))
    ref = _reference(x1, x2, params)
    assert out.shape == ref.shape
    assert jnp.allclose(out, ref, rtol=1e-5, atol=1e-5), "config A mismatch"

    # Config B: exercises multi-tile pooling, the 2-way parallel pool split,
    # a ragged (non-multiple-of-tile) last HW block and unequal C1/C2.
    kp, kx1, kx2 = jax.random.split(key_b, 3)
    params = _make_params(kp, 3, 5, 16, 8)
    x1 = jax.random.normal(kx1, (2, 3, 17, 18), jnp.float32)
    x2 = jax.random.normal(kx2, (2, 5, 17, 18), jnp.float32)
    out = jax.block_until_ready(feature_fusion(x1, x2, params, tile_hw=128))
    ref = _reference(x1, x2, params)
    assert out.shape == ref.shape
    assert jnp.allclose(out, ref, rtol=1e-5, atol=1e-5), "config B mismatch"

    print("KERNEL_OK")
</pallas_src>

<mosaic_0001>
module attributes {stable_mosaic.version = 11 : i64} {
  func.func @_pool_kernel(%arg0: i32, %arg1: i32, %arg2: i32, %arg3: memref<1x4x256xf32, #tpu.memory_space<vmem>>, %arg4: memref<1x4x256xf32, #tpu.memory_space<vmem>>, %arg5: memref<8x4xf32, #tpu.memory_space<vmem>>, %arg6: memref<8x4xf32, #tpu.memory_space<vmem>>, %arg7: memref<8x1xf32, #tpu.memory_space<vmem>>, %arg8: memref<1x1x8x1xf32, #tpu.memory_space<vmem>>) attributes {dimension_semantics = [#tpu.dimension_semantics<parallel>, #tpu.dimension_semantics<parallel>, #tpu.dimension_semantics<arbitrary>], iteration_bounds = array<i64: 2, 1, 1>, scalar_prefetch = 0 : i64, scratch_operands = 0 : i64, tpu.core_type = #tpu.core_type<tc>, window_params = [{transform_indices = @transform_0, window_bounds = array<i64: 1, 4, 256>}, {transform_indices = @transform_1, window_bounds = array<i64: 1, 4, 256>}, {pipeline_mode = #tpu.pipeline_mode<synchronous>, transform_indices = @transform_2, window_bounds = array<i64: 8, 4>}, {pipeline_mode = #tpu.pipeline_mode<synchronous>, transform_indices = @transform_3, window_bounds = array<i64: 8, 4>}, {pipeline_mode = #tpu.pipeline_mode<synchronous>, transform_indices = @transform_4, window_bounds = array<i64: 8, 1>}, {transform_indices = @transform_5, window_bounds = array<i64: 1, 1, 8, 1>}]} {
    %c1_i32 = arith.constant 1 : i32
    %0 = arith.muli %arg1, %c1_i32 : i32
    %1 = arith.addi %0, %arg2 : i32
    %c0 = arith.constant 0 : index
    %c0_0 = arith.constant 0 : index
    %2 = vector.load %arg5[%c0, %c0_0] : memref<8x4xf32, #tpu.memory_space<vmem>>, vector<8x4xf32>
    %c0_1 = arith.constant 0 : index
    %c0_2 = arith.constant 0 : index
    %c0_3 = arith.constant 0 : index
    %3 = vector.load %arg3[%c0_1, %c0_2, %c0_3] : memref<1x4x256xf32, #tpu.memory_space<vmem>>, vector<1x4x256xf32>
    %4 = vector.shape_cast %3 : vector<1x4x256xf32> to vector<4x256xf32>
    %cst = arith.constant dense<0.000000e+00> : vector<8x256xf32>
    %5 = tpu.matmul %2, %4, %cst {dimension_numbers = #tpu.dot_dimension_numbers<[1], [0], [0], [1], [0, 0, 1, 1], [], []>} : vector<8x4xf32>, vector<4x256xf32>, vector<8x256xf32> -> vector<8x256xf32>
    %c0_4 = arith.constant 0 : index
    %c0_5 = arith.constant 0 : index
    %6 = vector.load %arg6[%c0_4, %c0_5] : memref<8x4xf32, #tpu.memory_space<vmem>>, vector<8x4xf32>
    %c0_6 = arith.constant 0 : index
    %c0_7 = arith.constant 0 : index
    %c0_8 = arith.constant 0 : index
    %7 = vector.load %arg4[%c0_6, %c0_7, %c0_8] : memref<1x4x256xf32, #tpu.memory_space<vmem>>, vector<1x4x256xf32>
    %8 = vector.shape_cast %7 : vector<1x4x256xf32> to vector<4x256xf32>
    %cst_9 = arith.constant dense<0.000000e+00> : vector<8x256xf32>
    %9 = tpu.matmul %6, %8, %cst_9 {dimension_numbers = #tpu.dot_dimension_numbers<[1], [0], [0], [1], [0, 0, 1, 1], [], []>} : vector<8x4xf32>, vector<4x256xf32>, vector<8x256xf32> -> vector<8x256xf32>
    %10 = arith.addf %5, %9 : vector<8x256xf32>
    %c0_10 = arith.constant 0 : index
    %c0_11 = arith.constant 0 : index
    %11 = vector.load %arg7[%c0_10, %c0_11] : memref<8x1xf32, #tpu.memory_space<vmem>>, vector<8x1xf32>
    %12 = vector.broadcast %11 : vector<8x1xf32> to vector<8x256xf32>
    %13 = arith.addf %10, %12 : vector<8x256xf32>
    %cst_12 = arith.constant 0.000000e+00 : f32
    %14 = vector.broadcast %cst_12 : f32 to vector<8x256xf32>
    %15 = arith.maximumf %13, %14 : vector<8x256xf32>
    %c0_i32 = arith.constant 0 : i32
    %16 = arith.cmpi eq, %arg2, %c0_i32 : i32
    %17 = arith.extui %16 : i1 to i32
    %c0_i32_13 = arith.constant 0 : i32
    %18 = arith.cmpi ne, %17, %c0_i32_13 : i32
    scf.if %18 {
      %cst_18 = arith.constant 0.000000e+00 : f32
      %25 = vector.broadcast %cst_18 : f32 to vector<1x1x8x1xf32>
      %c0_19 = arith.constant 0 : index
      %c0_20 = arith.constant 0 : index
      %c0_21 = arith.constant 0 : index
      %c0_22 = arith.constant 0 : index
      %26 = vector.load %arg8[%c0_19, %c0_20, %c0_21, %c0_22] : memref<1x1x8x1xf32, #tpu.memory_space<vmem>>, vector<1x1x8x1xf32>
      tpu.vector_store %arg8[%c0_19, %c0_20, %c0_21, %c0_22], %25 {strides = array<i32>} : memref<1x1x8x1xf32, #tpu.memory_space<vmem>>, vector<1x1x8x1xf32>,
    } else {
    }
    %c0_i32_14 = arith.constant 0 : i32
    %19 = arith.cmpi slt, %1, %c0_i32_14 : i32
    %20 = arith.extui %19 : i1 to i32
    %c0_i32_15 = arith.constant 0 : i32
    %21 = arith.cmpi ne, %20, %c0_i32_15 : i32
    scf.if %21 {
      %c0_18 = arith.constant 0 : index
      %c0_19 = arith.constant 0 : index
      %c0_20 = arith.constant 0 : index
      %c0_21 = arith.constant 0 : index
      %25 = vector.load %arg8[%c0_18, %c0_19, %c0_20, %c0_21] : memref<1x1x8x1xf32, #tpu.memory_space<vmem>>, vector<1x1x8x1xf32>
      %26 = vector.shape_cast %25 : vector<1x1x8x1xf32> to vector<8x1xf32>
      %cst_22 = arith.constant dense<0.000000e+00> : vector<8xf32>
      %27 = vector.multi_reduction <add>, %15, %cst_22 [1] : vector<8x256xf32> to vector<8xf32>
      %28 = vector.shape_cast %27 : vector<8xf32> to vector<8x1xf32>
      %29 = arith.addf %26, %28 : vector<8x1xf32>
      %c0_23 = arith.constant 0 : index
      %c0_24 = arith.constant 0 : index
      %c0_25 = arith.constant 0 : index
      %c0_26 = arith.constant 0 : index
      %30 = vector.load %arg8[%c0_23, %c0_24, %c0_25, %c0_26] : memref<1x1x8x1xf32, #tpu.memory_space<vmem>>, vector<1x1x8x1xf32>
      %31 = vector.shape_cast %30 : vector<1x1x8x1xf32> to vector<8x1xf32>
      %32 = vector.shape_cast %29 : vector<8x1xf32> to vector<1x1x8x1xf32>
      tpu.vector_store %arg8[%c0_23, %c0_24, %c0_25, %c0_26], %32 {strides = array<i32>} : memref<1x1x8x1xf32, #tpu.memory_space<vmem>>, vector<1x1x8x1xf32>,
    } else {
    }
    %c0_i32_16 = arith.constant 0 : i32
    %22 = arith.cmpi sge, %1, %c0_i32_16 : i32
    %23 = arith.extui %22 : i1 to i32
    %c0_i32_17 = arith.constant 0 : i32
    %24 = arith.cmpi ne, %23, %c0_i32_17 : i32
    scf.if %24 {
      %c256_i32 = arith.constant 256 : i32
      %25 = arith.muli %1, %c256_i32 : i32
      %26 = tpu.iota {dimensions = array<i32: 1>} : vector<8x256xi32>
      %27 = vector.broadcast %25 : i32 to vector<8x256xi32>
      %28 = arith.addi %27, %26 : vector<8x256xi32>
      %c0_18 = arith.constant 0 : index
      %c0_19 = arith.constant 0 : index
      %c0_20 = arith.constant 0 : index
      %c0_21 = arith.constant 0 : index
      %29 = vector.load %arg8[%c0_18, %c0_19, %c0_20, %c0_21] : memref<1x1x8x1xf32, #tpu.memory_space<vmem>>, vector<1x1x8x1xf32>
      %30 = vector.shape_cast %29 : vector<1x1x8x1xf32> to vector<8x1xf32>
      %c256_i32_22 = arith.constant 256 : i32
      %31 = vector.broadcast %c256_i32_22 : i32 to vector<8x256xi32>
      %32 = arith.cmpi slt, %28, %31 : vector<8x256xi32>
      %cst_23 = arith.constant 0.000000e+00 : f32
      %33 = vector.broadcast %cst_23 : f32 to vector<8x256xf32>
      %34 = arith.select %32, %15, %33 : vector<8x256xi1>, vector<8x256xf32>
      %cst_24 = arith.constant dense<0.000000e+00> : vector<8xf32>
      %35 = vector.multi_reduction <add>, %34, %cst_24 [1] : vector<8x256xf32> to vector<8xf32>
      %36 = vector.shape_cast %35 : vector<8xf32> to vector<8x1xf32>
      %37 = arith.addf %30, %36 : vector<8x1xf32>
      %c0_25 = arith.constant 0 : index
      %c0_26 = arith.constant 0 : index
      %c0_27 = arith.constant 0 : index
      %c0_28 = arith.constant 0 : index
      %38 = vector.load %arg8[%c0_25, %c0_26, %c0_27, %c0_28] : memref<1x1x8x1xf32, #tpu.memory_space<vmem>>, vector<1x1x8x1xf32>
      %39 = vector.shape_cast %38 : vector<1x1x8x1xf32> to vector<8x1xf32>
      %40 = vector.shape_cast %37 : vector<8x1xf32> to vector<1x1x8x1xf32>
      tpu.vector_store %arg8[%c0_25, %c0_26, %c0_27, %c0_28], %40 {strides = array<i32>} : memref<1x1x8x1xf32, #tpu.memory_space<vmem>>, vector<1x1x8x1xf32>,
    } else {
    }
    return
  }
  func.func @transform_0(%arg0: i32, %arg1: i32, %arg2: i32) -> (i32, i32, i32) {
    %c1_i32 = arith.constant 1 : i32
    %0 = arith.muli %arg1, %c1_i32 : i32
    %1 = arith.addi %0, %arg2 : i32
    %c0_i32 = arith.constant 0 : i32
    %2 = arith.minsi %1, %c0_i32 : i32
    %c0_i32_0 = arith.constant 0 : i32
    %c0_i32_1 = arith.constant 0 : i32
    return %arg0, %c0_i32_0, %2 : i32, i32, i32
  }
  func.func @transform_1(%arg0: i32, %arg1: i32, %arg2: i32) -> (i32, i32, i32) {
    %c1_i32 = arith.constant 1 : i32
    %0 = arith.muli %arg1, %c1_i32 : i32
    %1 = arith.addi %0, %arg2 : i32
    %c0_i32 = arith.constant 0 : i32
    %2 = arith.minsi %1, %c0_i32 : i32
    %c0_i32_0 = arith.constant 0 : i32
    %c0_i32_1 = arith.constant 0 : i32
    return %arg0, %c0_i32_0, %2 : i32, i32, i32
  }
  func.func @transform_2(%arg0: i32, %arg1: i32, %arg2: i32) -> (i32, i32) {
    %c0_i32 = arith.constant 0 : i32
    %c0_i32_0 = arith.constant 0 : i32
    %c0_i32_1 = arith.constant 0 : i32
    return %c0_i32, %c0_i32_0 : i32, i32
  }
  func.func @transform_3(%arg0: i32, %arg1: i32, %arg2: i32) -> (i32, i32) {
    %c0_i32 = arith.constant 0 : i32
    %c0_i32_0 = arith.constant 0 : i32
    %c0_i32_1 = arith.constant 0 : i32
    return %c0_i32, %c0_i32_0 : i32, i32
  }
  func.func @transform_4(%arg0: i32, %arg1: i32, %arg2: i32) -> (i32, i32) {
    %c0_i32 = arith.constant 0 : i32
    %c0_i32_0 = arith.constant 0 : i32
    %c0_i32_1 = arith.constant 0 : i32
    return %c0_i32, %c0_i32_0 : i32, i32
  }
  func.func @transform_5(%arg0: i32, %arg1: i32, %arg2: i32) -> (i32, i32, i32, i32) {
    %c0_i32 = arith.constant 0 : i32
    %c0_i32_0 = arith.constant 0 : i32
    %c0_i32_1 = arith.constant 0 : i32
    return %arg0, %arg1, %c0_i32, %c0_i32_0 : i32, i32, i32, i32
  }
}

</mosaic_0001>

<bundles_post_ra>
// kernel: tpu_custom_call.1
= control target key start
LH: loop header
LB: loop body
LE: loop exit
PB: predicated region body
PF: predicated region fallthrough
CT: control target
= control target key end

     0   :  { %s763_s18 = smov 0   ;;  %s765_s19 = smov 0   ;;  %s810_s0 = inlined_call_operand.vmem [shape: f32[2,4,256], index: 0, kind: input, shape index: {}]   ;;  %s811_s1 = inlined_call_operand.vmem [shape: f32[2,4,256], index: 1, kind: input, shape index: {}]   ;;  %s812_s2 = inlined_call_operand.vmem [shape: f32[8,4], index: 2, kind: input, shape index: {}]   ;;  %s813_s3 = inlined_call_operand.vmem [shape: f32[8,4], index: 3, kind: input, shape index: {}]   ;;  %s814_s4 = inlined_call_operand.vmem [shape: f32[8,1], index: 4, kind: input, shape index: {}]   ;;  %s815_s5 = inlined_call_operand.vmem [shape: f32[2,1,8,1], index: 5, kind: output, shape index: {}]  }
   0x1   :  { %s767_s20 = smov 0  }
   0x2 LB: > { %s34_s21 = sadd.s32 1, %s725_s19  ;;  %p662_p0 = scmp.ge.s32.totalorder %s729_s20, 1  ;;  %s729_s20 = sphi %s767_s20, %s15_s20   ;;  %s725_s19 = sphi %s765_s19, %s817_s19   ;;  %s721_s18 = sphi %s763_s18, %s816_s18  }
   0x3   : > { %p36_p1 = scmp.ge.s32.totalorder %s34_s21, 2  ;;  %p256_p2 = scmp.lt.s32.totalorder %s729_s20, 3 }
   0x5   : > { %s819_s21 = smov (%p36_p1, %s34_s21), 0  ;;  %p257_p3 = pnand %p662_p0, %p256_p2 }
   0x6   : > { %p309_p4 = scmp.lt.s32.totalorder (!%p257_p3), %s721_s18, 1 }
   0x7   : > { %260 = sbr.rel (%p257_p3) target bundleno = 365 (0x16d), region = 40 }
   0xc   : > { %v731_v0 = vmov 0.0   ;;  %v511_v1 = vld [vmem:[%s814_s4] sm:$0xff]  ;;  %s821_s18 = smov (!%p309_p4, %s721_s18), 1  ;;  %v732_v2 = vmov 0   ;;  %vm355_vm0 = vcmask 1043456   ;;  %vm351_vm1 = vcmask 31744  }
   0xd   : > { %424 = vmatprep.mubr.f32.mxu0 %v731_v0  ;;  %504 = vmatprep.mubr.f32.mxu1 %v731_v0  ;;  %s676_s24 = sshll.u32 %s821_s18, 3  ;;  %v347_v7 = vld [vmem:[%s813_s3] sm:$0xff]  ;;  %vm525_vm2 = vcmask 7168  }
   0xe   : > { %704 = vset.pattern.permute.xlu0 %v732_v2  ;;  %s332_s27 = scalar_lea.vmem %s811_s1, %s676_s24  ;;  %s316_s30 = scalar_lea.vmem %s810_s0, %s676_s24  ;;  %v345_v8 = vld [vmem:[%s812_s2] sm:$0xff] }
   0xf   : > { %514 = vperm.xlu0 %704, %v511_v1   ;;  %v348_v3 = vld [vmem:[%s332_s27] sm:$0xff]  ;;  %s343_s12 = scalar_lea.vmem %s815_s5, %s676_s24 }
  0x10   : > { %v346_v4 = vld [vmem:[%s316_s30] sm:$0xff]  ;;  %v350_v5 = vcombine.high %v348_v3, %v348_v3  ;;  %526 = vst.msk [vmem:[%s343_s12] sm:$0xff] %vm525_vm2, %v731_v0 }
  0x11   : > { %v432_v6 = vcombine.high %v346_v4, %v346_v4 }
  0x12   : > { %668 = vmatprep.subr.msk.mxu0 %vm355_vm0, %v350_v5 }
  0x13   : > { %671 = vmatprep.subr.msk.mxu1 %vm355_vm0, %v432_v6  ;;  %669 = vmatpush1.msk.msra.mxu0 %vm355_vm0, %v348_v3 }
  0x14   : > { %672 = vmatpush1.msk.msra.mxu1 %vm355_vm0, %v346_v4  ;;  %670 = vmatmul.mubr.msk.f32.vlgmr.msra.gmra.mxu0 %vm351_vm1, %v347_v7 }
  0x15   : > { %673 = vmatmul.mubr.msk.f32.vlgmr.msra.gmra.mxu1 %vm351_vm1, %v345_v8 }
  0x17   : > { %v549_v21 = vld [vmem:[%s343_s12] sm:$0xff] }
  0x8a   : > { %v515_v9 = vpop.permute.xlu0 %514 }
  0xd4   : > { %v426_v10 = vpop.f32.mrf.mxu0 }
  0xd5   : > { %v506_v11 = vpop.f32.mrf.mxu1 }
  0xd6   : > { %v507_v12 = vadd.f32 %v506_v11, %v426_v10  ;;  %v428_v13 = vpop.f32.mrf.mxu0 }
  0xd7   : > { %v508_v14 = vpop.f32.mrf.mxu1 }
  0xd8   : > { %v517_v15 = vadd.f32 %v515_v9, %v507_v12  ;;  %v509_v16 = vadd.f32 %v508_v14, %v428_v13 }
  0xda   : > { %v518_v17 = vadd.f32 %v515_v9, %v509_v16  ;;  %v519_v18 = vmax.f32 %v517_v15, 0.0 }
  0xdc   : > { %v520_v19 = vmax.f32 %v518_v17, 0.0 }
  0xde   : > { %v554_v20 = vadd.f32 %v520_v19, %v519_v18 }
  0xe0   : > { %555 = vadd.xlane.f32.xlu0 %v554_v20 }
 0x169   : > { %v556_v22 = vpop.xlane.xlu0 %555 }
 0x16a   : > { %v557_v23 = vadd.f32 %v556_v22, %v549_v21 }
 0x16c   : > { %559 = vst.msk [vmem:[%s343_s12] sm:$0xff] %vm525_vm2, %v557_v23 }
 0x16d PF: > { %s15_s20 = sadd.s32 1, %s729_s20   ;;  %s816_s18 = smov %s725_s19 }
 0x16e   : > { %p12_p5 = scmp.ge.s32.totalorder %s15_s20, 4   ;;  %s817_s19 = smov %s819_s21 }
 0x170   :  { %14 = sbr.rel (!%p12_p5) target bundleno = 2 (0x2), region = 85 }

</bundles_post_ra>
